<compile_context>
chip_gen: v5e
topology: v5e:2x2
jax: 0.10.0
libtpu: 0.0.40
codegen_flags: <defaults>
</compile_context>

<pallas_src>
import functools

import jax
import jax.numpy as jnp
from jax.experimental import pallas as pl
from jax.experimental.pallas import tpu as pltpu

BN_EPS = 1e-5
F_PAD = 128        # lane-dense padded feature width for every layer
NEG_PAD = -1e30    # fill for padded logit lanes -> exp() underflows to exactly 0 (f32)


def _round_up(x, m):
    return (x + m - 1) // m * m


# ------------------------- fused Pallas kernel -------------------------

def _fused_gcn_kernel(x_ref, adj_ref, w_ref, b_ref, o_ref,
                      h_ref, xw_ref, acc_ref, *, num_layers, tm, tk):
    """Grid = (layer l, row block i, col block k); col axis is the reduction.

    x_ref:   (N_pad, 128) bf16   padded input features (resident, used at l == 0)
    adj_ref: (tm, tk)     bf16   streamed tile of the sym-normalized adjacency
    w_ref:   (128, 128)   bf16   BN-folded weight of layer l
    b_ref:   (1, 128)     f32    BN-folded bias of layer l (last layer padded w/ -1e30)
    o_ref:   (tm, 128)    f32    output row block (final layer writes log-softmax)
    h_ref:   (N_pad, 128) f32    resident activations (scratch)
    xw_ref:  (N_pad, 128) bf16   resident per-layer h @ W_l (scratch)
    acc_ref: (tm, 128)    f32    aggregation accumulator (scratch)
    """
    l = pl.program_id(0)
    i = pl.program_id(1)
    k = pl.program_id(2)
    nk = pl.num_programs(2)

    # --- once per layer: load h (layer 0) and compute xw = h @ W_l into scratch ---
    @pl.when(jnp.logical_and(i == 0, k == 0))
    def _():
        @pl.when(l == 0)
        def _():
            h_ref[...] = x_ref[...].astype(jnp.float32)
        xw_ref[...] = jnp.dot(
            h_ref[...].astype(jnp.bfloat16), w_ref[...],
            preferred_element_type=jnp.float32).astype(jnp.bfloat16)

    # --- aggregation: acc += adj_tile @ xw_tile (bf16 operands, f32 accumulate) ---
    @pl.when(k == 0)
    def _():
        acc_ref[...] = jnp.zeros_like(acc_ref)

    k_start = pl.multiple_of(k * tk, tk)
    acc_ref[...] += jnp.dot(adj_ref[...], xw_ref[pl.ds(k_start, tk), :],
                            preferred_element_type=jnp.float32)

    # --- finish this row block of layer l ---
    @pl.when(k == nk - 1)
    def _():
        z = acc_ref[...] + b_ref[...]          # f32 elementwise
        is_last = l == num_layers - 1

        @pl.when(jnp.logical_not(is_last))
        def _():
            # TODO(synk): F.dropout with p>0 would need pltpu.prng_*; module default p=0.0.
            h_new = jnp.maximum(z, 0.0)
            i_start = pl.multiple_of(i * tm, tm)
            h_ref[pl.ds(i_start, tm), :] = h_new
            o_ref[...] = h_new                 # benign; overwritten on last-layer revisit

        @pl.when(is_last)
        def _():
            m = jnp.max(z, axis=1, keepdims=True)
            zz = z - m
            lse = jnp.log(jnp.sum(jnp.exp(zz), axis=1, keepdims=True))
            o_ref[...] = zz - lse


# ------------------------- BN folding helper -------------------------

def _fold_bn_params(convs, bns):
    """Fold eval-mode BN into (W, b) of every hidden GCNConv. Exact: column scaling
    commutes with A_hat @ (x W)."""
    folded = []
    n = len(convs)
    for li in range(n):
        w, b = convs[li]
        if li < n - 1:
            gamma, beta, mean, var = bns[li]
            s = gamma * jax.lax.rsqrt(var + BN_EPS)      # (1, fout)
            folded.append((w * s, b * s + (beta - mean * s)))
        else:
            folded.append((w, b))
    return folded


# ------------------------- wrapper -------------------------

@jax.jit
def gcn_forward(x, adj_hat, params):
    """params = {'convs': [(W, b), ...], 'bns': [(gamma, beta, mean, var), ...]}"""
    N, input_dim = x.shape
    convs = params["convs"]
    bns = params["bns"]
    num_layers = len(convs)
    output_dim = convs[-1][0].shape[1]

    # ---- tiling: >=256 rows/cols per aggregation matmul when possible ----
    n8 = _round_up(N, 8)
    if n8 <= 256:
        tile = n8
        n_pad = n8
    else:
        tile = 256
        n_pad = _round_up(N, 256)
    tm = tk = tile
    nr = n_pad // tm
    nc = n_pad // tk

    # ---- trace-time BN folding + lane-dense padding ----
    folded = _fold_bn_params(convs, bns)
    w_stack = jnp.zeros((num_layers, F_PAD, F_PAD), jnp.float32)
    b_stack = jnp.zeros((num_layers, 1, F_PAD), jnp.float32)
    for li in range(num_layers):
        w_f, b_f = folded[li]
        fin, fout = w_f.shape
        pad_val = 0.0 if li < num_layers - 1 else NEG_PAD
        w_stack = w_stack.at[li, :fin, :fout].set(w_f)
        b_row = jnp.full((1, F_PAD), pad_val, jnp.float32).at[:, :fout].set(b_f)
        b_stack = b_stack.at[li].set(b_row)

    w_stack = w_stack.astype(jnp.bfloat16)           # MXU operands in bf16; bias stays f32
    x_pad = jnp.zeros((n_pad, F_PAD), jnp.bfloat16).at[:N, :input_dim].set(
        x.astype(jnp.bfloat16))
    adj_pad = jnp.zeros((n_pad, n_pad), jnp.bfloat16).at[:N, :N].set(
        adj_hat.astype(jnp.bfloat16))

    # ---- cost estimate (padded, matches what the kernel actually does) ----
    flops = num_layers * (2 * n_pad * F_PAD * F_PAD + 2 * n_pad * n_pad * F_PAD)
    transcendentals = n_pad * (F_PAD + 1)            # exp over 128 padded lanes + log/row
    bytes_accessed = (num_layers * n_pad * n_pad * 2       # adj streamed once per layer (bf16)
                      + n_pad * F_PAD * 2                   # x (bf16)
                      + num_layers * (F_PAD * F_PAD * 2 + F_PAD * 4)
                      + num_layers * n_pad * F_PAD * 4)     # output writebacks (revisits)

    # ---- explicit VMEM budget, clamped to 75% of physical capacity ----
    vmem_est = (2 * tm * tk * 2          # adj tile, double-buffered (bf16)
                + 2 * n_pad * F_PAD * 2  # x resident (bf16)
                + 2 * F_PAD * F_PAD * 2  # W block
                + 2 * F_PAD * 4          # bias block
                + 2 * tm * F_PAD * 4     # output block
                + n_pad * F_PAD * 4      # h scratch (f32)
                + n_pad * F_PAD * 2      # xw scratch (bf16)
                + tm * F_PAD * 4)        # acc scratch (f32)
    try:
        vmem_phys = pltpu.get_tpu_info().vmem_capacity_bytes
    except Exception:
        vmem_phys = 64 * 1024 * 1024
    vmem_limit = int(min(max(2 * vmem_est, 32 * 1024 * 1024), int(0.75 * vmem_phys)))

    out_pad = pl.pallas_call(
        functools.partial(_fused_gcn_kernel, num_layers=num_layers, tm=tm, tk=tk),
        out_shape=jax.ShapeDtypeStruct((n_pad, F_PAD), jnp.float32),
        grid_spec=pltpu.PrefetchScalarGridSpec(
            num_scalar_prefetch=0,
            grid=(num_layers, nr, nc),
            in_specs=[
                pl.BlockSpec((n_pad, F_PAD), lambda l, i, k: (0, 0)),           # x (resident)
                pl.BlockSpec((tm, tk), lambda l, i, k: (i, k)),                 # adj (streamed)
                pl.BlockSpec((None, F_PAD, F_PAD), lambda l, i, k: (l, 0, 0)),  # W_l
                pl.BlockSpec((None, 1, F_PAD), lambda l, i, k: (l, 0, 0)),      # b_l
            ],
            out_specs=pl.BlockSpec((tm, F_PAD), lambda l, i, k: (i, 0)),
            scratch_shapes=[
                pltpu.VMEM((n_pad, F_PAD), jnp.float32),   # h (resident activations)
                pltpu.VMEM((n_pad, F_PAD), jnp.bfloat16),  # xw (per-layer resident)
                pltpu.VMEM((tm, F_PAD), jnp.float32),      # acc
            ]),
        compiler_params=pltpu.CompilerParams(
            # Row axis stays "arbitrary": h/xw scratch carries cross-row-block deps
            # between layers, so megacore-splitting it would be incorrect here.
            dimension_semantics=("arbitrary", "arbitrary", "arbitrary"),
            vmem_limit_bytes=vmem_limit),
        cost_estimate=pl.CostEstimate(
            flops=int(flops),
            transcendentals=int(transcendentals),
            bytes_accessed=int(bytes_accessed)),
    )(x_pad, adj_pad, w_stack, b_stack)

    return out_pad[:N, :output_dim]


# ------------------------- glue: params & adjacency -------------------------

def make_params(key, input_dim, hidden_dim, output_dim, num_layers):
    dims = [input_dim] + [hidden_dim] * (num_layers - 1) + [output_dim]
    convs, bns = [], []
    for li in range(num_layers):
        key, kw, kb = jax.random.split(key, 3)
        fan_in, fan_out = dims[li], dims[li + 1]
        scale = 1.0 / jnp.sqrt(jnp.float32(fan_in))
        w = jax.random.uniform(kw, (fan_in, fan_out), jnp.float32, -scale, scale)
        b = jax.random.uniform(kb, (1, fan_out), jnp.float32, -scale, scale)
        convs.append((w, b))
    for li in range(num_layers - 1):
        key, kg, kb2, km, kv = jax.random.split(key, 5)
        gamma = 1.0 + 0.1 * jax.random.normal(kg, (1, hidden_dim), jnp.float32)
        beta = 0.1 * jax.random.normal(kb2, (1, hidden_dim), jnp.float32)
        mean = 0.1 * jax.random.normal(km, (1, hidden_dim), jnp.float32)
        var = 1.0 + 0.1 * jax.random.uniform(kv, (1, hidden_dim), jnp.float32)
        bns.append((gamma, beta, mean, var))
    return {"convs": convs, "bns": bns}


def make_normalized_adj(key, n_nodes, p_edge=0.25):
    # random symmetric adjacency + self loops, sym-normalized: D^{-1/2}(A+I)D^{-1/2}
    a = (jax.random.uniform(key, (n_nodes, n_nodes)) < p_edge).astype(jnp.float32)
    a = jnp.maximum(a, a.T)
    a = a * (1.0 - jnp.eye(n_nodes)) + jnp.eye(n_nodes)
    deg = jnp.sum(a, axis=1)
    d_inv_sqrt = 1.0 / jnp.sqrt(deg)
    return a * d_inv_sqrt[:, None] * d_inv_sqrt[None, :]


# ------------------------- references (pure JAX) -------------------------

def gcn_reference(x, adj_hat, params):
    """Exact f32 reference of the original module (eval-mode BN, dropout 0)."""
    convs, bns = params["convs"], params["bns"]
    h = x
    for li in range(len(convs) - 1):
        w, b = convs[li]
        gamma, beta, mean, var = bns[li]
        h = adj_hat @ (h @ w) + b
        h = (h - mean) * jax.lax.rsqrt(var + BN_EPS) * gamma + beta
        h = jnp.maximum(h, 0.0)
    w, b = convs[-1]
    logits = adj_hat @ (h @ w) + b
    return jax.nn.log_softmax(logits, axis=1).astype(jnp.float32)


def gcn_reference_mixed(x, adj_hat, params):
    """Reference matching the kernel's mixed precision (bf16 MXU operands, f32 acc)."""
    folded = _fold_bn_params(params["convs"], params["bns"])
    bf = lambda v: v.astype(jnp.bfloat16)
    adj_b = bf(adj_hat)
    h = x.astype(jnp.float32)
    for li, (w, b) in enumerate(folded):
        xw = jnp.dot(bf(h), bf(w), preferred_element_type=jnp.float32)
        h = jnp.dot(adj_b, bf(xw), preferred_element_type=jnp.float32) + b
        if li < len(folded) - 1:
            h = jnp.maximum(h, 0.0)
    return jax.nn.log_softmax(h, axis=1).astype(jnp.float32)


# ------------------------- main -------------------------

if __name__ == "__main__":
    key = jax.random.PRNGKey(0)
    k_feat, k_adj, k_par = jax.random.split(key, 3)

    N = 32            # nodes
    input_dim = 16
    hidden_dim = 32
    output_dim = 8
    num_layers = 3    # in->hid, hid->hid, hid->out ; 2 BN layers
    dropout = 0.0     # identity dropout (exact)

    x = jax.random.normal(k_feat, (N, input_dim), jnp.float32)
    adj_hat = make_normalized_adj(k_adj, N)
    params = make_params(k_par, input_dim, hidden_dim, output_dim, num_layers)

    out = gcn_forward(x, adj_hat, params)
    out = jax.block_until_ready(out)

    assert out.shape == (N, output_dim)
    assert out.dtype == jnp.float32
    # log-softmax rows must (exp-)sum to ~1 (softmax is computed in f32)
    row_sums = jnp.sum(jnp.exp(out), axis=1)
    assert jnp.allclose(row_sums, 1.0, atol=1e-4)
    # tight check vs mixed-precision (bf16 operand / f32 accum) reference
    ref_mixed = gcn_reference_mixed(x, adj_hat, params)
    assert jnp.allclose(out, ref_mixed, atol=2e-3, rtol=2e-3), \
        float(jnp.max(jnp.abs(out - ref_mixed)))
    # loose check vs exact f32 module reference (bf16 operand quantization)
    ref_f32 = gcn_reference(x, adj_hat, params)
    assert jnp.allclose(out, ref_f32, atol=1e-1, rtol=1e-1), \
        float(jnp.max(jnp.abs(out - ref_f32)))

    print("KERNEL_OK")
</pallas_src>

<mosaic_0001>
module attributes {stable_mosaic.version = 11 : i64} {
  func.func @_fused_gcn_kernel(%arg0: i32, %arg1: i32, %arg2: i32, %arg3: memref<32x128xbf16, #tpu.memory_space<vmem>>, %arg4: memref<32x32xbf16, #tpu.memory_space<vmem>>, %arg5: memref<1x128x128xbf16, #tpu.memory_space<vmem>>, %arg6: memref<1x1x128xf32, #tpu.memory_space<vmem>>, %arg7: memref<32x128xf32, #tpu.memory_space<vmem>>, %arg8: memref<32x128xf32, #tpu.memory_space<vmem>>, %arg9: memref<32x128xbf16, #tpu.memory_space<vmem>>, %arg10: memref<32x128xf32, #tpu.memory_space<vmem>>) attributes {dimension_semantics = [#tpu.dimension_semantics<arbitrary>, #tpu.dimension_semantics<arbitrary>, #tpu.dimension_semantics<arbitrary>], iteration_bounds = array<i64: 3, 1, 1>, scalar_prefetch = 0 : i64, scratch_operands = 3 : i64, tpu.core_type = #tpu.core_type<tc>, window_params = [{pipeline_mode = #tpu.pipeline_mode<synchronous>, transform_indices = @transform_0, window_bounds = array<i64: 32, 128>}, {transform_indices = @transform_1, window_bounds = array<i64: 32, 32>}, {transform_indices = @transform_2, window_bounds = array<i64: 1, 128, 128>}, {transform_indices = @transform_3, window_bounds = array<i64: 1, 1, 128>}, {transform_indices = @transform_4, window_bounds = array<i64: 32, 128>}]} {
    %c0_i32 = arith.constant 0 : i32
    %0 = arith.cmpi eq, %arg1, %c0_i32 : i32
    %c0_i32_0 = arith.constant 0 : i32
    %1 = arith.cmpi eq, %arg2, %c0_i32_0 : i32
    %2 = arith.andi %0, %1 : i1
    %3 = arith.extui %2 : i1 to i32
    %c0_i32_1 = arith.constant 0 : i32
    %4 = arith.cmpi ne, %3, %c0_i32_1 : i32
    scf.if %4 {
      %c0_i32_12 = arith.constant 0 : i32
      %20 = arith.cmpi eq, %arg0, %c0_i32_12 : i32
      %21 = arith.extui %20 : i1 to i32
      %c0_i32_13 = arith.constant 0 : i32
      %22 = arith.cmpi ne, %21, %c0_i32_13 : i32
      scf.if %22 {
        %c0_22 = arith.constant 0 : index
        %c0_23 = arith.constant 0 : index
        %30 = vector.load %arg3[%c0_22, %c0_23] : memref<32x128xbf16, #tpu.memory_space<vmem>>, vector<32x128xbf16>
        %31 = arith.extf %30 : vector<32x128xbf16> to vector<32x128xf32>
        %c0_24 = arith.constant 0 : index
        %c0_25 = arith.constant 0 : index
        %32 = vector.load %arg8[%c0_24, %c0_25] : memref<32x128xf32, #tpu.memory_space<vmem>>, vector<32x128xf32>
        tpu.vector_store %arg8[%c0_24, %c0_25], %31 {strides = array<i32>} : memref<32x128xf32, #tpu.memory_space<vmem>>, vector<32x128xf32>,
      } else {
      }
      %c0_14 = arith.constant 0 : index
      %c0_15 = arith.constant 0 : index
      %23 = vector.load %arg8[%c0_14, %c0_15] : memref<32x128xf32, #tpu.memory_space<vmem>>, vector<32x128xf32>
      %24 = arith.truncf %23 : vector<32x128xf32> to vector<32x128xbf16>
      %c0_16 = arith.constant 0 : index
      %c0_17 = arith.constant 0 : index
      %c0_18 = arith.constant 0 : index
      %25 = vector.load %arg5[%c0_16, %c0_17, %c0_18] : memref<1x128x128xbf16, #tpu.memory_space<vmem>>, vector<1x128x128xbf16>
      %26 = vector.shape_cast %25 : vector<1x128x128xbf16> to vector<128x128xbf16>
      %cst_19 = arith.constant dense<0.000000e+00> : vector<32x128xf32>
      %27 = tpu.matmul %24, %26, %cst_19 {dimension_numbers = #tpu.dot_dimension_numbers<[1], [0], [0], [1], [0, 0, 1, 1], [], []>} : vector<32x128xbf16>, vector<128x128xbf16>, vector<32x128xf32> -> vector<32x128xf32>
      %28 = arith.truncf %27 : vector<32x128xf32> to vector<32x128xbf16>
      %c0_20 = arith.constant 0 : index
      %c0_21 = arith.constant 0 : index
      %29 = vector.load %arg9[%c0_20, %c0_21] : memref<32x128xbf16, #tpu.memory_space<vmem>>, vector<32x128xbf16>
      tpu.vector_store %arg9[%c0_20, %c0_21], %28 {strides = array<i32>} : memref<32x128xbf16, #tpu.memory_space<vmem>>, vector<32x128xbf16>,
    } else {
    }
    %c0_i32_2 = arith.constant 0 : i32
    %5 = arith.cmpi eq, %arg2, %c0_i32_2 : i32
    %6 = arith.extui %5 : i1 to i32
    %c0_i32_3 = arith.constant 0 : i32
    %7 = arith.cmpi ne, %6, %c0_i32_3 : i32
    scf.if %7 {
      %cst_12 = arith.constant 0.000000e+00 : f32
      %20 = vector.broadcast %cst_12 : f32 to vector<32x128xf32>
      %c0_13 = arith.constant 0 : index
      %c0_14 = arith.constant 0 : index
      %21 = vector.load %arg10[%c0_13, %c0_14] : memref<32x128xf32, #tpu.memory_space<vmem>>, vector<32x128xf32>
      tpu.vector_store %arg10[%c0_13, %c0_14], %20 {strides = array<i32>} : memref<32x128xf32, #tpu.memory_space<vmem>>, vector<32x128xf32>,
    } else {
    }
    %c32_i32 = arith.constant 32 : i32
    %8 = arith.muli %arg2, %c32_i32 : i32
    %9 = tpu.assume_multiple %8, 32 : i32
    %c0 = arith.constant 0 : index
    %c0_4 = arith.constant 0 : index
    %10 = vector.load %arg10[%c0, %c0_4] : memref<32x128xf32, #tpu.memory_space<vmem>>, vector<32x128xf32>
    %c0_5 = arith.constant 0 : index
    %c0_6 = arith.constant 0 : index
    %11 = vector.load %arg4[%c0_5, %c0_6] : memref<32x32xbf16, #tpu.memory_space<vmem>>, vector<32x32xbf16>
    %12 = arith.index_cast %9 : i32 to index
    %c0_7 = arith.constant 0 : index
    %13 = vector.load %arg9[%12, %c0_7] : memref<32x128xbf16, #tpu.memory_space<vmem>>, vector<32x128xbf16>
    %cst = arith.constant dense<0.000000e+00> : vector<32x128xf32>
    %14 = tpu.matmul %11, %13, %cst {dimension_numbers = #tpu.dot_dimension_numbers<[1], [0], [0], [1], [0, 0, 1, 1], [], []>} : vector<32x32xbf16>, vector<32x128xbf16>, vector<32x128xf32> -> vector<32x128xf32>
    %15 = arith.addf %10, %14 : vector<32x128xf32>
    %c0_8 = arith.constant 0 : index
    %c0_9 = arith.constant 0 : index
    %16 = vector.load %arg10[%c0_8, %c0_9] : memref<32x128xf32, #tpu.memory_space<vmem>>, vector<32x128xf32>
    tpu.vector_store %arg10[%c0_8, %c0_9], %15 {strides = array<i32>} : memref<32x128xf32, #tpu.memory_space<vmem>>, vector<32x128xf32>,
    %c0_i32_10 = arith.constant 0 : i32
    %17 = arith.cmpi eq, %arg2, %c0_i32_10 : i32
    %18 = arith.extui %17 : i1 to i32
    %c0_i32_11 = arith.constant 0 : i32
    %19 = arith.cmpi ne, %18, %c0_i32_11 : i32
    scf.if %19 {
      %c0_12 = arith.constant 0 : index
      %c0_13 = arith.constant 0 : index
      %20 = vector.load %arg10[%c0_12, %c0_13] : memref<32x128xf32, #tpu.memory_space<vmem>>, vector<32x128xf32>
      %c0_14 = arith.constant 0 : index
      %c0_15 = arith.constant 0 : index
      %c0_16 = arith.constant 0 : index
      %21 = vector.load %arg6[%c0_14, %c0_15, %c0_16] : memref<1x1x128xf32, #tpu.memory_space<vmem>>, vector<1x1x128xf32>
      %22 = vector.shape_cast %21 : vector<1x1x128xf32> to vector<1x128xf32>
      %23 = vector.broadcast %22 : vector<1x128xf32> to vector<32x128xf32>
      %24 = arith.addf %20, %23 : vector<32x128xf32>
      %c2_i32 = arith.constant 2 : i32
      %25 = arith.cmpi eq, %arg0, %c2_i32 : i32
      %true = arith.constant true
      %26 = arith.xori %25, %true : i1
      %27 = arith.extui %26 : i1 to i32
      %c0_i32_17 = arith.constant 0 : i32
      %28 = arith.cmpi ne, %27, %c0_i32_17 : i32
      scf.if %28 {
        %cst_19 = arith.constant 0.000000e+00 : f32
        %31 = vector.broadcast %cst_19 : f32 to vector<32x128xf32>
        %32 = arith.maximumf %24, %31 : vector<32x128xf32>
        %c32_i32_20 = arith.constant 32 : i32
        %33 = arith.muli %arg1, %c32_i32_20 : i32
        %34 = tpu.assume_multiple %33, 32 : i32
        %35 = arith.index_cast %34 : i32 to index
        %c0_21 = arith.constant 0 : index
        %36 = vector.load %arg8[%35, %c0_21] : memref<32x128xf32, #tpu.memory_space<vmem>>, vector<32x128xf32>
        tpu.vector_store %arg8[%35, %c0_21], %32 {strides = array<i32>} : memref<32x128xf32, #tpu.memory_space<vmem>>, vector<32x128xf32>,
        %c0_22 = arith.constant 0 : index
        %c0_23 = arith.constant 0 : index
        %37 = vector.load %arg7[%c0_22, %c0_23] : memref<32x128xf32, #tpu.memory_space<vmem>>, vector<32x128xf32>
        tpu.vector_store %arg7[%c0_22, %c0_23], %32 {strides = array<i32>} : memref<32x128xf32, #tpu.memory_space<vmem>>, vector<32x128xf32>,
      } else {
      }
      %29 = arith.extui %25 : i1 to i32
      %c0_i32_18 = arith.constant 0 : i32
      %30 = arith.cmpi ne, %29, %c0_i32_18 : i32
      scf.if %30 {
        %cst_19 = arith.constant dense<0xFF800000> : vector<32xf32>
        %31 = vector.multi_reduction <maximumf>, %24, %cst_19 [1] : vector<32x128xf32> to vector<32xf32>
        %32 = vector.shape_cast %31 : vector<32xf32> to vector<32x1xf32>
        %33 = vector.broadcast %32 : vector<32x1xf32> to vector<32x128xf32>
        %34 = arith.subf %24, %33 : vector<32x128xf32>
        %35 = math.exp %34 : vector<32x128xf32>
        %cst_20 = arith.constant dense<0.000000e+00> : vector<32xf32>
        %36 = vector.multi_reduction <add>, %35, %cst_20 [1] : vector<32x128xf32> to vector<32xf32>
        %37 = vector.shape_cast %36 : vector<32xf32> to vector<32x1xf32>
        %38 = math.log %37 : vector<32x1xf32>
        %39 = vector.broadcast %38 : vector<32x1xf32> to vector<32x128xf32>
        %40 = arith.subf %34, %39 : vector<32x128xf32>
        %c0_21 = arith.constant 0 : index
        %c0_22 = arith.constant 0 : index
        %41 = vector.load %arg7[%c0_21, %c0_22] : memref<32x128xf32, #tpu.memory_space<vmem>>, vector<32x128xf32>
        tpu.vector_store %arg7[%c0_21, %c0_22], %40 {strides = array<i32>} : memref<32x128xf32, #tpu.memory_space<vmem>>, vector<32x128xf32>,
      } else {
      }
    } else {
    }
    return
  }
  func.func @transform_0(%arg0: i32, %arg1: i32, %arg2: i32) -> (i32, i32) {
    %c0_i32 = arith.constant 0 : i32
    %c0_i32_0 = arith.constant 0 : i32
    %c0_i32_1 = arith.constant 0 : i32
    return %c0_i32, %c0_i32_0 : i32, i32
  }
  func.func @transform_1(%arg0: i32, %arg1: i32, %arg2: i32) -> (i32, i32) {
    %c0_i32 = arith.constant 0 : i32
    return %arg1, %arg2 : i32, i32
  }
  func.func @transform_2(%arg0: i32, %arg1: i32, %arg2: i32) -> (i32, i32, i32) {
    %c0_i32 = arith.constant 0 : i32
    %c0_i32_0 = arith.constant 0 : i32
    %c0_i32_1 = arith.constant 0 : i32
    return %arg0, %c0_i32, %c0_i32_0 : i32, i32, i32
  }
  func.func @transform_3(%arg0: i32, %arg1: i32, %arg2: i32) -> (i32, i32, i32) {
    %c0_i32 = arith.constant 0 : i32
    %c0_i32_0 = arith.constant 0 : i32
    %c0_i32_1 = arith.constant 0 : i32
    return %arg0, %c0_i32, %c0_i32_0 : i32, i32, i32
  }
  func.func @transform_4(%arg0: i32, %arg1: i32, %arg2: i32) -> (i32, i32) {
    %c0_i32 = arith.constant 0 : i32
    %c0_i32_0 = arith.constant 0 : i32
    return %arg1, %c0_i32 : i32, i32
  }
}

</mosaic_0001>

<bundles_post_ra>
// kernel: gcn_forward.1
= control target key start
LH: loop header
LB: loop body
LE: loop exit
PB: predicated region body
PF: predicated region fallthrough
CT: control target
= control target key end

     0   :  { %s837_s15 = smov 0   ;;  %s839_s16 = smov 0   ;;  %s932_s0 = inlined_call_operand.vmem [shape: bf16[32,128], index: 0, kind: input, shape index: {}]   ;;  %s933_s1 = inlined_call_operand.vmem [shape: bf16[32,32], index: 1, kind: input, shape index: {}]   ;;  %s934_s2 = inlined_call_operand.vmem [shape: bf16[3,128,128], index: 2, kind: input, shape index: {}]   ;;  %s935_s3 = inlined_call_operand.vmem [shape: f32[3,1,128], index: 3, kind: input, shape index: {}]   ;;  %s936_s4 = inlined_call_operand.vmem [shape: f32[32,128], index: 4, kind: output, shape index: {}]  }
   0x1   :  { %s841_s17 = smov 0  }
   0x2 LB: > { %s33_s18 = sadd.s32 1, %s806_s16  ;;  %p646_p0 = scmp.ge.s32.totalorder %s810_s17, 1  ;;  %s810_s17 = sphi %s841_s17, %s14_s17   ;;  %s806_s16 = sphi %s839_s16, %s938_s16   ;;  %s802_s15 = sphi %s837_s15, %s937_s15  }
   0x3   : > { %p35_p1 = scmp.ge.s32.totalorder %s33_s18, 3  ;;  %p205_p2 = scmp.lt.s32.totalorder %s810_s17, 4 }
   0x5   : > { %s940_s18 = smov (%p35_p1, %s33_s18), 0  ;;  %p206_p3 = pnand %p646_p0, %p205_p2 }
   0x6   : > { %p251_p4 = scmp.lt.s32.totalorder (!%p206_p3), %s802_s15, 2  ;;  %p649_p5 = scmp.ne.s32.totalorder (!%p206_p3), %s802_s15, 0 }
   0x7   : > { %209 = sbr.rel (%p206_p3) target bundleno = 646 (0x286), region = 36 }
   0xc   : > { %s859_s19 = scalar_select %p251_p4, %s802_s15, 2 }
   0xd   : > { %275 = sbr.rel (%p649_p5) target bundleno = 25 (0x19), region = 44 }
   0xe   : > { %s706_s20 = sshll.u32 %s859_s19, 6  ;;  %s258_s23 = scalar_lea.vmem %s935_s3, %s859_s19 }
   0xf   : > { %s869_s26 = scalar_lea.vmem %s934_s2, %s706_s20 }
  0x12   : > { %v720_v0 = vld [vmem:[%s932_s0] sm:$0xff]   ;;  %v737_v1 = vld [vmem:[%s932_s0 + $0x8] sm:$0xff]  }
  0x13   : > { %v721_v2 = vunpack.c.l.bf16 %v720_v0  ;;  %v722_v3 = vunpack.c.h.bf16 %v720_v0  ;;  %v725_v4 = vunpack.c.l.bf16 %v737_v1  ;;  %v726_v5 = vunpack.c.h.bf16 %v737_v1 }
  0x15   : > { %284 = vst [vmem:[#allocation2 + $0x10] sm:$0xff] %v721_v2 }
  0x16   : > { %285 = vst [vmem:[#allocation2] sm:$0xff] %v722_v3 }
  0x17   : > { %286 = vst [vmem:[#allocation2 + $0x18] sm:$0xff] %v725_v4 }
  0x18   : > { %287 = vst [vmem:[#allocation2 + $0x8] sm:$0xff] %v726_v5 }
  0x19 PF: > { %v714_v6 = vld [vmem:[%s869_s26 + $0x38] sm:$0xff]  ;;  %v713_v7 = vld [vmem:[%s869_s26 + $0x30] sm:$0xff]  ;;  %v712_v8 = vld [vmem:[%s869_s26 + $0x28] sm:$0xff]  ;;  %vm431_vm0 = vcmask 261120   ;;  %p700_p6 = scmp.eq.s32.totalorder %s802_s15, 2 }
  0x1a   : > { %739 = vmatpush.bf16.msra.mxu2 %v714_v6  ;;  %358 = vmatpush.bf16.msra.mxu0 %v714_v6  ;;  %v711_v9 = vld [vmem:[%s869_s26 + $0x20] sm:$0xff]  ;;  %v710_v10 = vld [vmem:[%s869_s26 + $0x18] sm:$0xff]  ;;  %v709_v11 = vld [vmem:[%s869_s26 + $0x10] sm:$0xff] }
  0x1b   : > { %v708_v12 = vld [vmem:[%s869_s26 + $0x8] sm:$0xff]  ;;  %v707_v13 = vld [vmem:[%s869_s26] sm:$0xff] }
  0x1c   : > { %v288_v16 = vld [vmem:[#allocation2 + $0x10] sm:$0xff]  ;;  %v715_v28 = vld [vmem:[%s933_s1] sm:$0xff]  ;;  %v716_v29 = vld [vmem:[%s933_s1 + $0x8] sm:$0xff] }
  0x1d   : > { %v289_v17 = vld [vmem:[#allocation2] sm:$0xff] }
  0x1e   : > { %740 = vmatpush.bf16.msra.mxu2 %v713_v7  ;;  %359 = vmatpush.bf16.msra.mxu0 %v713_v7  ;;  %v290_v14 = vld [vmem:[#allocation2 + $0x18] sm:$0xff]  ;;  %v292_v19 = vpack.c.bf16 %v289_v17, %v288_v16  ;;  %v771_v30 = vld [vmem:[%s258_s23] ss:$0 sm:$0xff] }
  0x1f   : > { %v291_v15 = vld [vmem:[#allocation2 + $0x8] sm:$0xff] }
  0x20   : > { %v293_v18 = vpack.c.bf16 %v291_v15, %v290_v14 }
  0x22   : > { %741 = vmatpush.bf16.msra.mxu2 %v712_v8  ;;  %360 = vmatpush.bf16.msra.mxu0 %v712_v8 }
  0x26   : > { %742 = vmatpush.bf16.msra.mxu2 %v711_v9  ;;  %361 = vmatpush.bf16.msra.mxu0 %v711_v9 }
  0x2a   : > { %743 = vmatpush.bf16.msra.mxu2 %v710_v10  ;;  %362 = vmatpush.bf16.msra.mxu0 %v710_v10 }
  0x2e   : > { %744 = vmatpush.bf16.msra.mxu2 %v709_v11  ;;  %363 = vmatpush.bf16.msra.mxu0 %v709_v11 }
  0x32   : > { %745 = vmatpush.bf16.msra.mxu2 %v708_v12  ;;  %364 = vmatpush.bf16.msra.mxu0 %v708_v12 }
  0x36   : > { %746 = vmatpush.bf16.msra.mxu2 %v707_v13  ;;  %365 = vmatpush.bf16.msra.mxu0 %v707_v13 }
  0x39   : > { %371 = vmatmul.bf16.vlgmr.msra.gmra.mxu2 %v293_v18  ;;  %366 = vmatmul.bf16.vlgmr.msra.gmra.mxu0 %v292_v19 }
  0xb6   : > { %v367_v20 = vpop.f32.mrf.mxu0 }
  0xbc   : > { %v372_v21 = vpop.f32.mrf.mxu2 }
  0xbe   : > { %v369_v22 = vpop.f32.mrf.mxu0 }
  0xbf   : > { %v730_v23 = vpack.c.bf16 %v369_v22, %v367_v20 }
  0xc1   : > { %731 = vst [vmem:[#allocation3] sm:$0xff] %v730_v23  }
  0xc4   : > { %v374_v24 = vpop.f32.mrf.mxu2 }
  0xc5   : > { %v735_v25 = vpack.c.bf16 %v374_v24, %v372_v21 }
  0xc7   : > { %738 = vst [vmem:[#allocation3 + $0x8] sm:$0xff] %v735_v25  }
  0xc8   : > { %v717_v27 = vld [vmem:[#allocation3] sm:$0xff] }
  0xce   : > { %v718_v26 = vld [vmem:[#allocation3 + $0x8] sm:$0xff] }
  0xcf   : > { %444 = vmatpush.bf16.msra.mxu1 %v718_v26 }
  0xd3   : > { %445 = vmatpush.bf16.msra.mxu1 %v717_v27 }
  0xd6   : > { %698 = vmatmul.msk.bf16.vlgmr.msra.gmra.mxu1 %vm431_vm0, %v715_v28 }
  0xe6   : > { %699 = vmatmul.msk.bf16.gmra.mxu1 %vm431_vm0, %v716_v29 }
 0x153   : > { %v447_v31 = vpop.f32.mrf.mxu1 }
 0x154   : > { %v476_v32 = vadd.f32 %v771_v30, %v447_v31 }
 0x15b   : > { %v449_v33 = vpop.f32.mrf.mxu1 }
 0x15c   : > { %v477_v34 = vadd.f32 %v771_v30, %v449_v33 }
 0x163   : > { %v452_v35 = vpop.f32.mrf.mxu1 }
 0x164   : > { %v478_v36 = vadd.f32 %v771_v30, %v452_v35 }
 0x168   : > { %484 = sbr.rel (%p700_p6) target bundleno = 375 (0x177), region = 56 }
 0x16b   : > { %v454_v37 = vpop.f32.mrf.mxu1 }
 0x16c   : > { %v479_v38 = vadd.f32 %v771_v30, %v454_v37 }
 0x16d   : > { %v485_v39 = vmax.f32 %v476_v32, 0.0  ;;  %v486_v40 = vmax.f32 %v477_v34, 0.0  ;;  %v487_v41 = vmax.f32 %v478_v36, 0.0 }
 0x16e   : > { %v488_v42 = vmax.f32 %v479_v38, 0.0 }
 0x16f   : > { %491 = vst [vmem:[#allocation2 + $0x10] sm:$0xff] %v485_v39 }
 0x170   : > { %495 = vst [vmem:[%s936_s4] sm:$0xff] %v485_v39 }
 0x171   : > { %492 = vst [vmem:[#allocation2] sm:$0xff] %v486_v40 }
 0x172   : > { %496 = vst [vmem:[%s936_s4 + $0x8] sm:$0xff] %v486_v40 }
 0x173   : > { %493 = vst [vmem:[#allocation2 + $0x18] sm:$0xff] %v487_v41 }
 0x174   : > { %497 = vst [vmem:[%s936_s4 + $0x10] sm:$0xff] %v487_v41 }
 0x175   : > { %494 = vst [vmem:[#allocation2 + $0x8] sm:$0xff] %v488_v42 }
 0x176   : > { %498 = vst [vmem:[%s936_s4 + $0x18] sm:$0xff] %v488_v42 }
 0x177 PF: > { %p701_p7 = scmp.ne.s32.totalorder %s802_s15, 2 }
 0x179   : > { %501 = sbr.rel (%p701_p7) target bundleno = 646 (0x286), region = 60 }
 0x17e   : > { %506 = vmax.xlane.f32.xlu1 %v478_v36  ;;  %502 = vmax.xlane.f32.xlu0 %v476_v32 }
 0x186   : > { %508 = vmax.xlane.f32.xlu1 %v479_v38  ;;  %504 = vmax.xlane.f32.xlu0 %v477_v34 }
 0x1f1   : > { %v507_v43 = vpop.xlane.xlu1 %506  ;;  %v503_v44 = vpop.xlane.xlu0 %502 }
 0x1f2   : > { %v512_v45 = vsub.f32 %v478_v36, %v507_v43  ;;  %v510_v46 = vsub.f32 %v476_v32, %v503_v44 }
 0x1f4   : > { %v518_v47 = vmul.f32 1.442695, %v512_v45  ;;  %v514_v48 = vmul.f32 1.442695, %v510_v46 }
 0x1f6   : > { %772 = vpow2.f32 %v518_v47 }
 0x1f7   : > { %774 = vpow2.f32 %v514_v48 }
 0x1f9   : > { %v509_v49 = vpop.xlane.xlu1 %508  ;;  %v505_v50 = vpop.xlane.xlu0 %504 }
 0x1fa   : > { %v513_v51 = vsub.f32 %v479_v38, %v509_v49  ;;  %v511_v52 = vsub.f32 %v477_v34, %v505_v50 }
 0x1fc   : > { %v773_v53 = vpop.eup %772  ;;  %v520_v54 = vmul.f32 1.442695, %v513_v51  ;;  %v516_v55 = vmul.f32 1.442695, %v511_v52 }
 0x1fd   : > { %v775_v56 = vpop.eup %774  ;;  %526 = vadd.xlane.f32.xlu0 %v773_v53 }
 0x1fe   : > { %776 = vpow2.f32 %v520_v54  ;;  %522 = vadd.xlane.f32.xlu2 %v775_v56 }
 0x1ff   : > { %778 = vpow2.f32 %v516_v55 }
 0x204   : > { %v777_v57 = vpop.eup %776 }
 0x205   : > { %v779_v58 = vpop.eup %778  ;;  %528 = vadd.xlane.f32.xlu1 %v777_v57 }
 0x206   : > { %524 = vadd.xlane.f32.xlu2 %v779_v58 }
 0x270   : > { %v527_v59 = vpop.xlane.xlu0 %526 }
 0x271   : > { %v523_v60 = vpop.xlane.xlu2 %522  ;;  %780 = vlog2.f32 %v527_v59 }
 0x272   : > { %782 = vlog2.f32 %v523_v60 }
 0x277   : > { %v781_v61 = vpop.eup %780 }
 0x278   : > { %v783_v62 = vpop.eup %782  ;;  %v535_v63 = vmul.f32 0.6931472, %v781_v61  ;;  %v529_v0 = vpop.xlane.xlu1 %528 }
 0x279   : > { %v531_v1 = vmul.f32 0.6931472, %v783_v62  ;;  %784 = vlog2.f32 %v529_v0  ;;  %v525_v2 = vpop.xlane.xlu2 %524 }
 0x27a   : > { %v540_v3 = vsub.f32 %v512_v45, %v535_v63  ;;  %786 = vlog2.f32 %v525_v2 }
 0x27b   : > { %v538_v4 = vsub.f32 %v510_v46, %v531_v1 }
 0x27c   : > { %544 = vst [vmem:[%s936_s4 + $0x10] sm:$0xff] %v540_v3 }
 0x27d   : > { %542 = vst [vmem:[%s936_s4] sm:$0xff] %v538_v4 }
 0x27f   : > { %v785_v5 = vpop.eup %784 }
 0x280   : > { %v787_v6 = vpop.eup %786  ;;  %v537_v7 = vmul.f32 0.6931472, %v785_v5 }
 0x281   : > { %v533_v8 = vmul.f32 0.6931472, %v787_v6 }
 0x282   : > { %v541_v9 = vsub.f32 %v513_v51, %v537_v7 }
 0x283   : > { %v539_v10 = vsub.f32 %v511_v52, %v533_v8 }
 0x284   : > { %545 = vst [vmem:[%s936_s4 + $0x18] sm:$0xff] %v541_v9 }
 0x285   : > { %543 = vst [vmem:[%s936_s4 + $0x8] sm:$0xff] %v539_v10 }
 0x286 PF: > { %s14_s17 = sadd.s32 1, %s810_s17   ;;  %s937_s15 = smov %s806_s16 }
 0x287   : > { %p11_p8 = scmp.ge.s32.totalorder %s14_s17, 5   ;;  %s938_s16 = smov %s940_s18 }
 0x289   :  { %13 = sbr.rel (!%p11_p8) target bundleno = 2 (0x2), region = 98 }

</bundles_post_ra>
